<compile_context>
chip_gen: v7x
topology: tpu7x:2x2x1
jax: 0.10.0
libtpu: 0.0.40
codegen_flags: <defaults>
</compile_context>

<pallas_src>
import functools

import jax
import jax.numpy as jnp
from jax.experimental import pallas as pl
from jax.experimental.pallas import tpu as pltpu


def ffn_kernel(*refs, apply_dropout):
    """One row-tile of: dropout(relu(x @ W1 + b1) @ W2 + b2)."""
    if apply_dropout:
        x_ref, w1_ref, b1_ref, w2_ref, b2_ref, mask_ref, o_ref = refs
    else:
        x_ref, w1_ref, b1_ref, w2_ref, b2_ref, o_ref = refs
        mask_ref = None

    # Linear 1 + ReLU (MXU matmul in the weights' dtype, f32 accumulation).
    x = x_ref[...].astype(w1_ref.dtype)
    h = jnp.dot(x, w1_ref[...], preferred_element_type=jnp.float32)
    h = jnp.maximum(h + b1_ref[...], 0.0)

    # Linear 2 (cast hidden to the MXU dtype, accumulate in f32).
    y = jnp.dot(h.astype(w2_ref.dtype), w2_ref[...],
                preferred_element_type=jnp.float32)
    y = y + b2_ref[...]

    # Inverted dropout: mask holds 0.0 or 1/keep_prob -> single fused VPU mul.
    if apply_dropout:
        y = y * mask_ref[...]

    o_ref[...] = y.astype(o_ref.dtype)


def feedforward(x, w1, b1, w2, b2, *, key=None, dropout_p=0.1,
                deterministic=False, tm=256, compute_dtype=jnp.bfloat16):
    """x: (B, T, C).  w1: (C, 4C), b1: (4C,), w2: (4C, C), b2: (C,).

    Weights are stored (in_features, out_features), i.e. the transpose of
    PyTorch's nn.Linear weight, so the kernel does plain y = x @ W + b.
    """
    B, T, C = x.shape
    H = w1.shape[1]
    M = B * T

    apply_dropout = (not deterministic) and dropout_p > 0.0
    keep_prob = 1.0 - dropout_p

    # ---- row tiling: pad M up to a multiple of tm (no silent truncation) ----
    tm = min(tm, M)
    num_tiles = pl.cdiv(M, tm)
    Mp = num_tiles * tm

    x2 = x.reshape(M, C)
    if Mp != M:
        x2 = jnp.pad(x2, ((0, Mp - M), (0, 0)))

    # Weights in bf16 (MXU dtype), biases stay f32 for the epilogue.
    w1c = w1.astype(compute_dtype)
    w2c = w2.astype(compute_dtype)
    b1_2 = b1.reshape(1, H).astype(jnp.float32)
    b2_2 = b2.reshape(1, C).astype(jnp.float32)

    in_specs = [
        pl.BlockSpec((tm, C), lambda i: (i, 0)),   # x row-tile (pipelined)
        pl.BlockSpec((C, H), lambda i: (0, 0)),    # W1 (resident)
        pl.BlockSpec((1, H), lambda i: (0, 0)),    # b1
        pl.BlockSpec((H, C), lambda i: (0, 0)),    # W2 (resident)
        pl.BlockSpec((1, C), lambda i: (0, 0)),    # b2
    ]
    args = [x2, w1c, b1_2, w2c, b2_2]

    if apply_dropout:
        if key is None:
            key = jax.random.PRNGKey(0)
        keep = jax.random.bernoulli(key, keep_prob, (Mp, C))
        mask = keep.astype(jnp.float32) * jnp.float32(1.0 / keep_prob)
        in_specs.append(pl.BlockSpec((tm, C), lambda i: (i, 0)))  # mask row-tile
        args.append(mask)

    out = pl.pallas_call(
        functools.partial(ffn_kernel, apply_dropout=apply_dropout),
        out_shape=jax.ShapeDtypeStruct((Mp, C), x.dtype),
        grid=(num_tiles,),
        in_specs=in_specs,
        out_specs=pl.BlockSpec((tm, C), lambda i: (i, 0)),
        compiler_params=pltpu.CompilerParams(
            dimension_semantics=("parallel",),     # rows are independent
            vmem_limit_bytes=64 * 1024 * 1024,
        ),
    )(*args)

    if Mp != M:
        out = out[:M]
    return out.reshape(B, T, C)


def init_params(key, n_embd):
    """Deterministic PyTorch-style init: U(-1/sqrt(fan_in), 1/sqrt(fan_in))."""
    hidden = 4 * n_embd
    k1, k2, k3, k4 = jax.random.split(key, 4)
    bound1 = 1.0 / jnp.sqrt(n_embd)
    bound2 = 1.0 / jnp.sqrt(hidden)
    w1 = jax.random.uniform(k1, (n_embd, hidden), jnp.float32, -bound1, bound1)
    b1 = jax.random.uniform(k2, (hidden,), jnp.float32, -bound1, bound1)
    w2 = jax.random.uniform(k3, (hidden, n_embd), jnp.float32, -bound2, bound2)
    b2 = jax.random.uniform(k4, (n_embd,), jnp.float32, -bound2, bound2)
    return w1, b1, w2, b2


if __name__ == "__main__":
    # Small shapes consistent with the module's (B, T, n_embd) usage; n_embd is
    # kept a multiple of 128 so the output is lane-dense.
    B, T, n_embd = 2, 8, 128

    key = jax.random.PRNGKey(0)
    kx, kp, kd = jax.random.split(key, 3)
    x = jax.random.normal(kx, (B, T, n_embd), dtype=jnp.float32)
    w1, b1, w2, b2 = init_params(kp, n_embd)

    # Pure-JAX reference (eval mode, f32).
    ref = jnp.maximum(x.reshape(-1, n_embd) @ w1 + b1, 0.0) @ w2 + b2
    ref = ref.reshape(B, T, n_embd)

    # Eval-mode pass in full f32 -> exact-ish match.
    y_f32 = feedforward(x, w1, b1, w2, b2, deterministic=True,
                        compute_dtype=jnp.float32)
    y_f32 = jax.block_until_ready(y_f32)
    assert jnp.allclose(y_f32, ref, atol=1e-5, rtol=1e-5), "f32 mismatch vs reference"

    # Eval-mode pass with bf16 matmuls (the performance path) -> loose match.
    y_bf16 = feedforward(x, w1, b1, w2, b2, deterministic=True,
                         compute_dtype=jnp.bfloat16)
    y_bf16 = jax.block_until_ready(y_bf16)
    assert jnp.allclose(y_bf16, ref, atol=3e-2, rtol=3e-2), "bf16 mismatch vs reference"

    # Training-mode pass with dropout=0.1 (deterministic given the key).
    y_train = feedforward(x, w1, b1, w2, b2, key=kd, dropout_p=0.1,
                          deterministic=False)
    y_train = jax.block_until_ready(y_train)
    assert y_train.shape == (B, T, n_embd)
    zero_frac = jnp.mean(y_train == 0.0)
    assert 0.02 < float(zero_frac) < 0.3, "dropout zero-fraction looks wrong"

    print("KERNEL_OK")
</pallas_src>

<mosaic_0001>
module attributes {stable_mosaic.version = 11 : i64} {
  func.func @ffn_kernel(%arg0: i32, %arg1: memref<16x128xf32, #tpu.memory_space<vmem>>, %arg2: memref<128x512xf32, #tpu.memory_space<vmem>>, %arg3: memref<1x512xf32, #tpu.memory_space<vmem>>, %arg4: memref<512x128xf32, #tpu.memory_space<vmem>>, %arg5: memref<1x128xf32, #tpu.memory_space<vmem>>, %arg6: memref<16x128xf32, #tpu.memory_space<vmem>>) attributes {dimension_semantics = [#tpu.dimension_semantics<parallel>], iteration_bounds = array<i64: 1>, scalar_prefetch = 0 : i64, scratch_operands = 0 : i64, tpu.core_type = #tpu.core_type<tc>, window_params = [{transform_indices = @transform_0, window_bounds = array<i64: 16, 128>}, {pipeline_mode = #tpu.pipeline_mode<synchronous>, transform_indices = @transform_1, window_bounds = array<i64: 128, 512>}, {pipeline_mode = #tpu.pipeline_mode<synchronous>, transform_indices = @transform_2, window_bounds = array<i64: 1, 512>}, {pipeline_mode = #tpu.pipeline_mode<synchronous>, transform_indices = @transform_3, window_bounds = array<i64: 512, 128>}, {pipeline_mode = #tpu.pipeline_mode<synchronous>, transform_indices = @transform_4, window_bounds = array<i64: 1, 128>}, {transform_indices = @transform_5, window_bounds = array<i64: 16, 128>}]} {
    %c0 = arith.constant 0 : index
    %c0_0 = arith.constant 0 : index
    %0 = vector.load %arg1[%c0, %c0_0] : memref<16x128xf32, #tpu.memory_space<vmem>>, vector<16x128xf32>
    %c0_1 = arith.constant 0 : index
    %c0_2 = arith.constant 0 : index
    %1 = vector.load %arg2[%c0_1, %c0_2] : memref<128x512xf32, #tpu.memory_space<vmem>>, vector<128x512xf32>
    %cst = arith.constant dense<0.000000e+00> : vector<16x512xf32>
    %2 = tpu.matmul %0, %1, %cst {dimension_numbers = #tpu.dot_dimension_numbers<[1], [0], [0], [1], [0, 0, 1, 1], [], []>} : vector<16x128xf32>, vector<128x512xf32>, vector<16x512xf32> -> vector<16x512xf32>
    %c0_3 = arith.constant 0 : index
    %c0_4 = arith.constant 0 : index
    %3 = vector.load %arg3[%c0_3, %c0_4] : memref<1x512xf32, #tpu.memory_space<vmem>>, vector<1x512xf32>
    %4 = vector.broadcast %3 : vector<1x512xf32> to vector<16x512xf32>
    %5 = arith.addf %2, %4 : vector<16x512xf32>
    %cst_5 = arith.constant 0.000000e+00 : f32
    %6 = vector.broadcast %cst_5 : f32 to vector<16x512xf32>
    %7 = arith.maximumf %5, %6 : vector<16x512xf32>
    %c0_6 = arith.constant 0 : index
    %c0_7 = arith.constant 0 : index
    %8 = vector.load %arg4[%c0_6, %c0_7] : memref<512x128xf32, #tpu.memory_space<vmem>>, vector<512x128xf32>
    %cst_8 = arith.constant dense<0.000000e+00> : vector<16x128xf32>
    %9 = tpu.matmul %7, %8, %cst_8 {dimension_numbers = #tpu.dot_dimension_numbers<[1], [0], [0], [1], [0, 0, 1, 1], [], []>} : vector<16x512xf32>, vector<512x128xf32>, vector<16x128xf32> -> vector<16x128xf32>
    %c0_9 = arith.constant 0 : index
    %c0_10 = arith.constant 0 : index
    %10 = vector.load %arg5[%c0_9, %c0_10] : memref<1x128xf32, #tpu.memory_space<vmem>>, vector<1x128xf32>
    %11 = vector.broadcast %10 : vector<1x128xf32> to vector<16x128xf32>
    %12 = arith.addf %9, %11 : vector<16x128xf32>
    %c0_11 = arith.constant 0 : index
    %c0_12 = arith.constant 0 : index
    %13 = vector.load %arg6[%c0_11, %c0_12] : memref<16x128xf32, #tpu.memory_space<vmem>>, vector<16x128xf32>
    tpu.vector_store %arg6[%c0_11, %c0_12], %12 {strides = array<i32>} : memref<16x128xf32, #tpu.memory_space<vmem>>, vector<16x128xf32>,
    return
  }
  func.func @transform_0(%arg0: i32) -> (i32, i32) {
    %c0_i32 = arith.constant 0 : i32
    %c0_i32_0 = arith.constant 0 : i32
    return %arg0, %c0_i32 : i32, i32
  }
  func.func @transform_1(%arg0: i32) -> (i32, i32) {
    %c0_i32 = arith.constant 0 : i32
    %c0_i32_0 = arith.constant 0 : i32
    %c0_i32_1 = arith.constant 0 : i32
    return %c0_i32, %c0_i32_0 : i32, i32
  }
  func.func @transform_2(%arg0: i32) -> (i32, i32) {
    %c0_i32 = arith.constant 0 : i32
    %c0_i32_0 = arith.constant 0 : i32
    %c0_i32_1 = arith.constant 0 : i32
    return %c0_i32, %c0_i32_0 : i32, i32
  }
  func.func @transform_3(%arg0: i32) -> (i32, i32) {
    %c0_i32 = arith.constant 0 : i32
    %c0_i32_0 = arith.constant 0 : i32
    %c0_i32_1 = arith.constant 0 : i32
    return %c0_i32, %c0_i32_0 : i32, i32
  }
  func.func @transform_4(%arg0: i32) -> (i32, i32) {
    %c0_i32 = arith.constant 0 : i32
    %c0_i32_0 = arith.constant 0 : i32
    %c0_i32_1 = arith.constant 0 : i32
    return %c0_i32, %c0_i32_0 : i32, i32
  }
  func.func @transform_5(%arg0: i32) -> (i32, i32) {
    %c0_i32 = arith.constant 0 : i32
    %c0_i32_0 = arith.constant 0 : i32
    return %arg0, %c0_i32 : i32, i32
  }
}

</mosaic_0001>

<bundles_post_ra>
// kernel: tpu_custom_call.1
= control target key start
LH: loop header
LB: loop body
LE: loop exit
PB: predicated region body
PF: predicated region fallthrough
CT: control target
= control target key end

     0   :  { %10 = vsyncpa [#allocation3], 0  ;;  %s1059_s0 = inlined_call_operand.hbm [shape: f32[16,128], index: 0, kind: input, shape index: {}]   ;;  %s1060_s1 = inlined_call_operand.hbm [shape: f32[128,512], index: 1, kind: input, shape index: {}]   ;;  %s1061_s2 = inlined_call_operand.hbm [shape: f32[1,512], index: 2, kind: input, shape index: {}]   ;;  %s1062_s3 = inlined_call_operand.hbm [shape: f32[512,128], index: 3, kind: input, shape index: {}]   ;;  %s1063_s4 = inlined_call_operand.hbm [shape: f32[1,128], index: 4, kind: input, shape index: {}]   ;;  %s1064_s5 = inlined_call_operand.hbm [shape: f32[16,128], index: 5, kind: output, shape index: {}]  }
   0x1   :  { %11 = vsyncpa [#allocation6], 0 }
   0x2   :  { %12 = vsyncpa [#allocation9], 0 }
   0x3   :  { %13 = vsyncpa [#allocation4], 0  ;;  %s933_s18 = smov [#allocation5]   ;;  %s793_s22 = scalar_lea.hbm %s1060_s1, 8192 }
   0x4   :  { %s31_s19 = sshll.u32 %s933_s18, 4  ;;  %p794_p0 = scmp.ne.s32.totalorder %s1060_s1, %s793_s22  ;;  %s32_s19 = int_to_ptr.vmem [resolvable:$true] %s31_s19 }
   0x5   :  { %p797_p1 = scmp.lt.u32.totalorder %s793_s22, %s1060_s1 }
   0x7   :  { %p799_p2 = pnand %p797_p1, %p794_p0 }
   0x9   :  { %802 = shalt.err (!%p799_p2)
}
   0xa   :  { %s803_s27 = scalar_lea.vmem %s32_s19, 8192  ;;  %p808_p4 = scmp.lt.s32.totalorder %s32_s19, %s32_s19 }
   0xb   :  { %p804_p3 = scmp.ne.s32.totalorder %s32_s19, %s803_s27  ;;  %p809_p5 = scmp.lt.s32.totalorder %s803_s27, %s803_s27 }
   0xd   :  { %p810_p6 = por %p809_p5, %p808_p4 }
   0xf   :  { %p811_p7 = pnand %p810_p6, %p804_p3 }
  0x11   :  { %814 = shalt.err (!%p811_p7)
}
  0x12   :  { %s934_s28 = smov 512   ;;  %s935_s29 = smov 32  }
  0x13   :  { %37 = dma.hbm_to_vmem [thread:$0]  %s1060_s1, 8192, %s32_s19, [#allocation6], %s934_s28, %s934_s28, %s935_s29  }
  0x14   :  { %s936_s7 = smov [#allocation8]   ;;  %s937_s9 = smov [#allocation2]  }
  0x15   :  { %s53_s8 = sshll.u32 %s936_s7, 4  ;;  %s19_s10 = sshll.u32 %s937_s9, 4  ;;  %s54_s8 = int_to_ptr.vmem [resolvable:$true] %s53_s8  ;;  %s20_s10 = int_to_ptr.vmem [resolvable:$true] %s19_s10 }
  0x16   :  { %s815_s13 = scalar_lea.hbm %s1062_s3, 8192 }
  0x17   :  { %p816_p8 = scmp.ne.s32.totalorder %s1062_s3, %s815_s13  ;;  %p819_p9 = scmp.lt.u32.totalorder %s815_s13, %s1062_s3 }
  0x19   :  { %p821_p10 = pnand %p819_p9, %p816_p8 }
  0x1b   :  { %824 = shalt.err (!%p821_p10)
}
  0x1c   :  { %s825_s1 = scalar_lea.vmem %s54_s8, 8192  ;;  %p830_p12 = scmp.lt.s32.totalorder %s54_s8, %s54_s8 }
  0x1d   :  { %p826_p11 = scmp.ne.s32.totalorder %s54_s8, %s825_s1  ;;  %p831_p13 = scmp.lt.s32.totalorder %s825_s1, %s825_s1 }
  0x1f   :  { %p832_p0 = por %p831_p13, %p830_p12 }
  0x21   :  { %p833_p1 = pnand %p832_p0, %p826_p11 }
  0x23   :  { %836 = shalt.err (!%p833_p1)
}
  0x24   :  { %s938_s18 = smov 128   ;;  %s939_s19 = smov 8  }
  0x25   :  { %59 = dma.hbm_to_vmem [thread:$0]  %s1062_s3, 8192, %s54_s8, [#allocation9], %s938_s18, %s938_s18, %s939_s19  }
  0x26   :  { %s837_s24 = scalar_lea.hbm %s1059_s0, 256 }
  0x27   :  { %p838_p2 = scmp.ne.s32.totalorder %s1059_s0, %s837_s24  ;;  %p841_p3 = scmp.lt.u32.totalorder %s837_s24, %s1059_s0 }
  0x29   :  { %p843_p4 = pnand %p841_p3, %p838_p2 }
  0x2b   :  { %846 = shalt.err (!%p843_p4)
}
  0x2c   :  { %s847_s29 = scalar_lea.vmem %s20_s10, 256  ;;  %p852_p6 = scmp.lt.s32.totalorder %s20_s10, %s20_s10 }
  0x2d   :  { %p848_p5 = scmp.ne.s32.totalorder %s20_s10, %s847_s29  ;;  %p853_p7 = scmp.lt.s32.totalorder %s847_s29, %s847_s29 }
  0x2f   :  { %p854_p8 = por %p853_p7, %p852_p6 }
  0x31   :  { %p855_p9 = pnand %p854_p8, %p848_p5 }
  0x33   :  { %858 = shalt.err (!%p855_p9)
}
  0x34   :  { %25 = dma.hbm_to_vmem [thread:$0]  %s1059_s0, 256, %s20_s10, [#allocation3], %s938_s18, %s938_s18, %s939_s19  }
  0x35   :  { %s940_s6 = smov [#allocation7]   ;;  %s941_s8 = smov [#allocation10]  }
  0x36   :  { %s44_s7 = sshll.u32 %s940_s6, 4  ;;  %s66_s9 = sshll.u32 %s941_s8, 4  ;;  %s45_s7 = int_to_ptr.vmem [resolvable:$true] %s44_s7  ;;  %s67_s9 = int_to_ptr.vmem [resolvable:$true] %s66_s9 }
  0x37   :  { %s859_s13 = scalar_lea.hbm %s1061_s2, 64 }
  0x38   :  { %p860_p10 = scmp.ne.s32.totalorder %s1061_s2, %s859_s13  ;;  %p863_p11 = scmp.lt.u32.totalorder %s859_s13, %s1061_s2 }
  0x3a   :  { %p865_p12 = pnand %p863_p11, %p860_p10 }
  0x3c   :  { %868 = shalt.err (!%p865_p12)
}
  0x3d   :  { %s869_s0 = scalar_lea.vmem %s45_s7, 64  ;;  %p874_p0 = scmp.lt.s32.totalorder %s45_s7, %s45_s7 }
  0x3e   :  { %p870_p13 = scmp.ne.s32.totalorder %s45_s7, %s869_s0  ;;  %p875_p1 = scmp.lt.s32.totalorder %s869_s0, %s869_s0 }
  0x40   :  { %p876_p2 = por %p875_p1, %p874_p0 }
  0x42   :  { %p877_p3 = pnand %p876_p2, %p870_p13 }
  0x44   :  { %880 = shalt.err (!%p877_p3)
}
  0x45   :  { %47 = dma.hbm_to_vmem [thread:$0]  %s1061_s2, 64, %s45_s7, [#allocation6]  }
  0x46   :  { %s881_s22 = scalar_lea.hbm %s1063_s4, 16 }
  0x47   :  { %p882_p4 = scmp.ne.s32.totalorder %s1063_s4, %s881_s22  ;;  %p885_p5 = scmp.lt.u32.totalorder %s881_s22, %s1063_s4 }
  0x49   :  { %p887_p6 = pnand %p885_p5, %p882_p4 }
  0x4b   :  { %890 = shalt.err (!%p887_p6)
}
  0x4c   :  { %s891_s27 = scalar_lea.vmem %s67_s9, 16  ;;  %s895_s28 = scalar_lea.vmem %s67_s9, 32 }
  0x4d   :  { %p892_p7 = scmp.ne.s32.totalorder %s67_s9, %s891_s27  ;;  %p896_p8 = scmp.lt.s32.totalorder %s67_s9, %s67_s9 }
  0x4e   :  { %p897_p9 = scmp.lt.s32.totalorder %s895_s28, %s891_s27 }
  0x50   :  { %p898_p10 = por %p897_p9, %p896_p8 }
  0x52   :  { %p899_p11 = pnand %p898_p10, %p892_p7 }
  0x54   :  { %902 = shalt.err (!%p899_p11)
}
  0x55   :  { %69 = dma.hbm_to_vmem [thread:$0]  %s1063_s4, 16, %s67_s9, [#allocation9]  }
  0x56   :  { %925 = dma.done.wait [#allocation3], 256  }
  0x57   :  { %926 = vsyncadd [#allocation3], 4294967040 }
  0x58   :  { %927 = dma.done.wait [#allocation6], 8256  }
  0x59   :  { %928 = vsyncadd [#allocation6], 4294959040 }
  0x5a   :  { %929 = dma.done.wait [#allocation9], 8208  }
  0x5b   :  { %930 = vsyncadd [#allocation9], 4294959088  ;;  %v942_v0 = vmov 0.0   ;;  %v88_v1 = vld [vmem:[#allocation5 + $0x8] sm:$0xff]  ;;  %v90_v3 = vld [vmem:[#allocation5 + $0x18] sm:$0xff]  ;;  %s943_s4 = smov [#allocation11]  }
  0x5c   :  { %237 = vmatprep.mubr.f32.mxu0 %v942_v0  ;;  %314 = vmatprep.mubr.f32.mxu1 %v942_v0  ;;  %v92_v2 = vld [vmem:[#allocation5 + $0x28] sm:$0xff]  ;;  %v94_v5 = vld [vmem:[#allocation5 + $0x38] sm:$0xff]  ;;  %v87_v6 = vld [vmem:[#allocation5] sm:$0xff]  ;;  %s563_s3 = sshll.u32 %s943_s4, 4  ;;  %s564_s3 = int_to_ptr.vmem [resolvable:$true] %s563_s3 }
  0x5d   :  { %v654_v4 = vpack.c.bf16 %v92_v2, %v88_v1  ;;  %v91_v7 = vld [vmem:[#allocation5 + $0x20] sm:$0xff]  ;;  %v686_v8 = vpack.c.bf16 %v94_v5, %v90_v3  ;;  %v89_v10 = vld [vmem:[#allocation5 + $0x10] sm:$0xff]  ;;  %v96_v12 = vld [vmem:[#allocation5 + $0x48] sm:$0xff]  ;;  %s903_s30 = scalar_lea.vmem %s564_s3, 256  ;;  %p908_p13 = scmp.lt.s32.totalorder %s564_s3, %s564_s3 }
  0x5e   :  { %v656_v9 = vpack.c.bf16 %v91_v7, %v87_v6  ;;  %v93_v11 = vld [vmem:[#allocation5 + $0x30] sm:$0xff]  ;;  %v100_v14 = vld [vmem:[#allocation5 + $0x68] sm:$0xff]  ;;  %v98_v15 = vld [vmem:[#allocation5 + $0x58] sm:$0xff]  ;;  %p904_p12 = scmp.ne.s32.totalorder %s564_s3, %s903_s30  ;;  %p909_p0 = scmp.lt.s32.totalorder %s903_s30, %s903_s30 }
  0x5f   :  { %655 = vmatprep.subr.bf16.mxu0 %v654_v4  ;;  %v688_v13 = vpack.c.bf16 %v93_v11, %v89_v10  ;;  %v102_v16 = vld [vmem:[#allocation5 + $0x78] sm:$0xff]  ;;  %687 = vmatprep.subr.bf16.mxu1 %v686_v8  ;;  %v658_v17 = vpack.c.bf16 %v100_v14, %v96_v12  ;;  %v95_v19 = vld [vmem:[#allocation5 + $0x40] sm:$0xff]  ;;  %v97_v21 = vld [vmem:[#allocation5 + $0x50] sm:$0xff] }
  0x60   :  { %657 = vmatpush1.bf16.msra.mxu0 %v656_v9  ;;  %v690_v18 = vpack.c.bf16 %v102_v16, %v98_v15  ;;  %v99_v20 = vld [vmem:[#allocation5 + $0x60] sm:$0xff]  ;;  %v101_v23 = vld [vmem:[#allocation5 + $0x70] sm:$0xff]  ;;  %v104_v24 = vld [vmem:[#allocation5 + $0x88] sm:$0xff]  ;;  %p910_p1 = por %p909_p0, %p908_p13 }
  0x61   :  { %689 = vmatpush1.bf16.msra.mxu1 %v688_v13  ;;  %v660_v22 = vpack.c.bf16 %v99_v20, %v95_v19  ;;  %v108_v25 = vld [vmem:[#allocation5 + $0xa8] sm:$0xff]  ;;  %659 = vmatprep.subr.bf16.mxu0 %v658_v17  ;;  %v692_v26 = vpack.c.bf16 %v101_v23, %v97_v21  ;;  %v106_v28 = vld [vmem:[#allocation5 + $0x98] sm:$0xff]  ;;  %v103_v30 = vld [vmem:[#allocation5 + $0x80] sm:$0xff] }
  0x62   :  { %691 = vmatprep.subr.bf16.mxu1 %v690_v18  ;;  %v662_v27 = vpack.c.bf16 %v108_v25, %v104_v24  ;;  %v110_v29 = vld [vmem:[#allocation5 + $0xb8] sm:$0xff]  ;;  %v107_v32 = vld [vmem:[#allocation5 + $0xa0] sm:$0xff]  ;;  %v105_v33 = vld [vmem:[#allocation5 + $0x90] sm:$0xff]  ;;  %p911_p2 = pnand %p910_p1, %p904_p12 }
  0x63   :  { %v694_v31 = vpack.c.bf16 %v110_v29, %v106_v28  ;;  %v109_v34 = vld [vmem:[#allocation5 + $0xb0] sm:$0xff]  ;;  %v664_v35 = vpack.c.bf16 %v107_v32, %v103_v30  ;;  %v112_v36 = vld [vmem:[#allocation5 + $0xc8] sm:$0xff]  ;;  %v114_v38 = vld [vmem:[#allocation5 + $0xd8] sm:$0xff] }
  0x64   :  { %661 = vmatpush1.bf16.msra.mxu0 %v660_v22  ;;  %v116_v37 = vld [vmem:[#allocation5 + $0xe8] sm:$0xff]  ;;  %v696_v39 = vpack.c.bf16 %v109_v34, %v105_v33  ;;  %v118_v41 = vld [vmem:[#allocation5 + $0xf8] sm:$0xff]  ;;  %v111_v42 = vld [vmem:[#allocation5 + $0xc0] sm:$0xff] }
  0x65   :  { %693 = vmatpush1.bf16.msra.mxu1 %v692_v26  ;;  %663 = vmatprep.subr.bf16.mxu0 %v662_v27  ;;  %v666_v40 = vpack.c.bf16 %v116_v37, %v112_v36  ;;  %v115_v43 = vld [vmem:[#allocation5 + $0xe0] sm:$0xff]  ;;  %v698_v44 = vpack.c.bf16 %v118_v41, %v114_v38  ;;  %v113_v45 = vld [vmem:[#allocation5 + $0xd0] sm:$0xff]  ;;  %v120_v47 = vld [vmem:[#allocation5 + $0x108] sm:$0xff] }
  0x66   :  { %695 = vmatprep.subr.bf16.mxu1 %v694_v31  ;;  %v117_v46 = vld [vmem:[#allocation5 + $0xf0] sm:$0xff]  ;;  %v124_v48 = vld [vmem:[#allocation5 + $0x128] sm:$0xff]  ;;  %v122_v49 = vld [vmem:[#allocation5 + $0x118] sm:$0xff]  ;;  %v668_v51 = vpack.c.bf16 %v115_v43, %v111_v42 }
  0x67   :  { %v126_v50 = vld [vmem:[#allocation5 + $0x138] sm:$0xff]  ;;  %v700_v52 = vpack.c.bf16 %v117_v46, %v113_v45  ;;  %v670_v53 = vpack.c.bf16 %v124_v48, %v120_v47  ;;  %v119_v54 = vld [vmem:[#allocation5 + $0x100] sm:$0xff]  ;;  %v121_v56 = vld [vmem:[#allocation5 + $0x110] sm:$0xff] }
  0x68   :  { %665 = vmatpush1.bf16.msra.mxu0 %v664_v35  ;;  %v123_v55 = vld [vmem:[#allocation5 + $0x120] sm:$0xff]  ;;  %v702_v57 = vpack.c.bf16 %v126_v50, %v122_v49  ;;  %v125_v58 = vld [vmem:[#allocation5 + $0x130] sm:$0xff]  ;;  %v128_v59 = vld [vmem:[#allocation5 + $0x148] sm:$0xff] }
  0x69   :  { %697 = vmatpush1.bf16.msra.mxu1 %v696_v39  ;;  %667 = vmatprep.subr.bf16.mxu0 %v666_v40  ;;  %v132_v60 = vld [vmem:[#allocation5 + $0x168] sm:$0xff]  ;;  %v130_v61 = vld [vmem:[#allocation5 + $0x158] sm:$0xff]  ;;  %v672_v63 = vpack.c.bf16 %v123_v55, %v119_v54  ;;  %v704_v1 = vpack.c.bf16 %v125_v58, %v121_v56  ;;  %v127_v3 = vld [vmem:[#allocation5 + $0x140] sm:$0xff] }
  0x6a   :  { %699 = vmatprep.subr.bf16.mxu1 %v698_v44  ;;  %v134_v62 = vld [vmem:[#allocation5 + $0x178] sm:$0xff]  ;;  %v674_v2 = vpack.c.bf16 %v132_v60, %v128_v59  ;;  %v131_v4 = vld [vmem:[#allocation5 + $0x160] sm:$0xff]  ;;  %v129_v5 = vld [vmem:[#allocation5 + $0x150] sm:$0xff] }
  0x6b   :  { %v706_v6 = vpack.c.bf16 %v134_v62, %v130_v61  ;;  %v133_v7 = vld [vmem:[#allocation5 + $0x170] sm:$0xff]  ;;  %v136_v8 = vld [vmem:[#allocation5 + $0x188] sm:$0xff]  ;;  %v138_v10 = vld [vmem:[#allocation5 + $0x198] sm:$0xff]  ;;  %v676_v12 = vpack.c.bf16 %v131_v4, %v127_v3 }
  0x6c   :  { %669 = vmatpush1.bf16.msra.mxu0 %v668_v51  ;;  %v140_v9 = vld [vmem:[#allocation5 + $0x1a8] sm:$0xff]  ;;  %v142_v11 = vld [vmem:[#allocation5 + $0x1b8] sm:$0xff]  ;;  %v708_v13 = vpack.c.bf16 %v133_v7, %v129_v5  ;;  %v135_v15 = vld [vmem:[#allocation5 + $0x180] sm:$0xff] }
  0x6d   :  { %701 = vmatpush1.bf16.msra.mxu1 %v700_v52  ;;  %671 = vmatprep.subr.bf16.mxu0 %v670_v53  ;;  %v678_v14 = vpack.c.bf16 %v140_v9, %v136_v8  ;;  %v139_v16 = vld [vmem:[#allocation5 + $0x1a0] sm:$0xff]  ;;  %v137_v17 = vld [vmem:[#allocation5 + $0x190] sm:$0xff]  ;;  %v710_v18 = vpack.c.bf16 %v142_v11, %v138_v10  ;;  %v144_v20 = vld [vmem:[#allocation5 + $0x1c8] sm:$0xff] }
  0x6e   :  { %703 = vmatprep.subr.bf16.mxu1 %v702_v57  ;;  %v141_v19 = vld [vmem:[#allocation5 + $0x1b0] sm:$0xff]  ;;  %v148_v21 = vld [vmem:[#allocation5 + $0x1e8] sm:$0xff]  ;;  %v146_v22 = vld [vmem:[#allocation5 + $0x1d8] sm:$0xff]  ;;  %v680_v24 = vpack.c.bf16 %v139_v16, %v135_v15 }
  0x6f   :  { %v150_v23 = vld [vmem:[#allocation5 + $0x1f8] sm:$0xff]  ;;  %v712_v25 = vpack.c.bf16 %v141_v19, %v137_v17  ;;  %v682_v26 = vpack.c.bf16 %v148_v21, %v144_v20  ;;  %v143_v27 = vld [vmem:[#allocation5 + $0x1c0] sm:$0xff]  ;;  %v145_v29 = vld [vmem:[#allocation5 + $0x1d0] sm:$0xff] }
  0x70   :  { %673 = vmatpush1.bf16.msra.mxu0 %v672_v63  ;;  %v147_v28 = vld [vmem:[#allocation5 + $0x1e0] sm:$0xff]  ;;  %v714_v30 = vpack.c.bf16 %v150_v23, %v146_v22  ;;  %v149_v31 = vld [vmem:[#allocation5 + $0x1f0] sm:$0xff]  ;;  %v86_v59 = vld [vmem:[#allocation2 + $0x8] sm:$0xff] }
  0x71   :  { %705 = vmatpush1.bf16.msra.mxu1 %v704_v1  ;;  %675 = vmatprep.subr.bf16.mxu0 %v674_v2  ;;  %v351_v32 = vld [vmem:[#allocation8 + $0x80] sm:$0xff]  ;;  %v352_v33 = vld [vmem:[#allocation8 + $0x88] sm:$0xff]  ;;  %v684_v36 = vpack.c.bf16 %v147_v28, %v143_v27  ;;  %v716_v37 = vpack.c.bf16 %v149_v31, %v145_v29  ;;  %v353_v44 = vld [vmem:[#allocation8 + $0x90] sm:$0xff] }
  0x72   :  { %707 = vmatprep.subr.bf16.mxu1 %v706_v6  ;;  %v383_v34 = vld [vmem:[#allocation8 + $0x180] sm:$0xff]  ;;  %v384_v35 = vld [vmem:[#allocation8 + $0x188] sm:$0xff]  ;;  %v718_v38 = vpack.c.bf16 %v352_v33, %v351_v32  ;;  %v354_v45 = vld [vmem:[#allocation8 + $0x98] sm:$0xff] }
  0x73   :  { %v750_v39 = vpack.c.bf16 %v384_v35, %v383_v34  ;;  %v335_v40 = vld [vmem:[#allocation8] sm:$0xff]  ;;  %v336_v41 = vld [vmem:[#allocation8 + $0x8] sm:$0xff]  ;;  %v385_v47 = vld [vmem:[#allocation8 + $0x190] sm:$0xff]  ;;  %v722_v51 = vpack.c.bf16 %v354_v45, %v353_v44 }
  0x74   :  { %677 = vmatpush1.bf16.msra.mxu0 %v676_v12  ;;  %v367_v42 = vld [vmem:[#allocation8 + $0x100] sm:$0xff]  ;;  %v368_v43 = vld [vmem:[#allocation8 + $0x108] sm:$0xff]  ;;  %v386_v48 = vld [vmem:[#allocation8 + $0x198] sm:$0xff]  ;;  %v720_v49 = vpack.c.bf16 %v336_v41, %v335_v40 }
  0x75   :  { %709 = vmatpush1.bf16.msra.mxu1 %v708_v13  ;;  %679 = vmatprep.subr.bf16.mxu0 %v678_v14  ;;  %v85_v46 = vld [vmem:[#allocation2] sm:$0xff]  ;;  %v752_v50 = vpack.c.bf16 %v368_v43, %v367_v42  ;;  %v338_v53 = vld [vmem:[#allocation8 + $0x18] sm:$0xff]  ;;  %v754_v55 = vpack.c.bf16 %v386_v48, %v385_v47  ;;  %v355_v57 = vld [vmem:[#allocation8 + $0xa0] sm:$0xff] }
  0x76   :  { %711 = vmatprep.subr.bf16.mxu1 %v710_v18  ;;  %v337_v52 = vld [vmem:[#allocation8 + $0x10] sm:$0xff]  ;;  %v370_v56 = vld [vmem:[#allocation8 + $0x118] sm:$0xff]  ;;  %v356_v58 = vld [vmem:[#allocation8 + $0xa8] sm:$0xff] }
  0x77   :  { %v369_v54 = vld [vmem:[#allocation8 + $0x110] sm:$0xff]  ;;  %v387_v60 = vld [vmem:[#allocation8 + $0x1a0] sm:$0xff]  ;;  %v388_v61 = vld [vmem:[#allocation8 + $0x1a8] sm:$0xff]  ;;  %v724_v62 = vpack.c.bf16 %v338_v53, %v337_v52  ;;  %v726_v1 = vpack.c.bf16 %v356_v58, %v355_v57 }
  0x78   :  { %681 = vmatpush1.bf16.msra.mxu0 %v680_v24  ;;  %v756_v63 = vpack.c.bf16 %v370_v56, %v369_v54  ;;  %v339_v2 = vld [vmem:[#allocation8 + $0x20] sm:$0xff]  ;;  %v340_v3 = vld [vmem:[#allocation8 + $0x28] sm:$0xff]  ;;  %v758_v5 = vpack.c.bf16 %v388_v61, %v387_v60  ;;  %v357_v7 = vld [vmem:[#allocation8 + $0xb0] sm:$0xff] }
  0x79   :  { %713 = vmatpush1.bf16.msra.mxu1 %v712_v25  ;;  %683 = vmatprep.subr.bf16.mxu0 %v682_v26  ;;  %v371_v4 = vld [vmem:[#allocation8 + $0x120] sm:$0xff]  ;;  %v372_v6 = vld [vmem:[#allocation8 + $0x128] sm:$0xff]  ;;  %v358_v8 = vld [vmem:[#allocation8 + $0xb8] sm:$0xff] }
  0x7a   :  { %715 = vmatprep.subr.bf16.mxu1 %v714_v30  ;;  %v389_v9 = vld [vmem:[#allocation8 + $0x1b0] sm:$0xff]  ;;  %v390_v10 = vld [vmem:[#allocation8 + $0x1b8] sm:$0xff]  ;;  %v760_v11 = vpack.c.bf16 %v372_v6, %v371_v4  ;;  %v730_v12 = vpack.c.bf16 %v358_v8, %v357_v7  ;;  %v359_v18 = vld [vmem:[#allocation8 + $0xc0] sm:$0xff] }
  0x7b   :  { %v341_v13 = vld [vmem:[#allocation8 + $0x30] sm:$0xff]  ;;  %v342_v14 = vld [vmem:[#allocation8 + $0x38] sm:$0xff]  ;;  %v762_v16 = vpack.c.bf16 %v390_v10, %v389_v9  ;;  %v360_v19 = vld [vmem:[#allocation8 + $0xc8] sm:$0xff] }
  0x7c   :  { %685 = vmatpush1.bf16.msra.mxu0 %v684_v36  ;;  %v373_v15 = vld [vmem:[#allocation8 + $0x130] sm:$0xff]  ;;  %v374_v17 = vld [vmem:[#allocation8 + $0x138] sm:$0xff]  ;;  %v391_v20 = vld [vmem:[#allocation8 + $0x1c0] sm:$0xff]  ;;  %v732_v22 = vpack.c.bf16 %v342_v14, %v341_v13  ;;  %v734_v24 = vpack.c.bf16 %v360_v19, %v359_v18 }
  0x7d   :  { %717 = vmatpush1.bf16.msra.mxu1 %v716_v37  ;;  %719 = vmatprep.subr.bf16.mxu0 %v718_v38  ;;  %v392_v21 = vld [vmem:[#allocation8 + $0x1c8] sm:$0xff]  ;;  %v764_v23 = vpack.c.bf16 %v374_v17, %v373_v15  ;;  %v343_v25 = vld [vmem:[#allocation8 + $0x40] sm:$0xff]  ;;  %v361_v30 = vld [vmem:[#allocation8 + $0xd0] sm:$0xff] }
  0x7e   :  { %751 = vmatprep.subr.bf16.mxu1 %v750_v39  ;;  %v344_v26 = vld [vmem:[#allocation8 + $0x48] sm:$0xff]  ;;  %v375_v27 = vld [vmem:[#allocation8 + $0x140] sm:$0xff]  ;;  %v766_v28 = vpack.c.bf16 %v392_v21, %v391_v20  ;;  %v362_v31 = vld [vmem:[#allocation8 + $0xd8] sm:$0xff] }
  0x7f   :  { %238 = vmatmul.mubr.f32.vlgmr.msra.gmra.mrb[0].mxu0 %v85_v46  ;;  %v376_v29 = vld [vmem:[#allocation8 + $0x148] sm:$0xff]  ;;  %v393_v32 = vld [vmem:[#allocation8 + $0x1d0] sm:$0xff]  ;;  %v394_v33 = vld [vmem:[#allocation8 + $0x1d8] sm:$0xff]  ;;  %v736_v34 = vpack.c.bf16 %v344_v26, %v343_v25  ;;  %v738_v36 = vpack.c.bf16 %v362_v31, %v361_v30 }
  0x80   :  { %315 = vmatmul.mubr.f32.vlgmr.msra.gmra.mrb[0].mxu1 %v85_v46  ;;  %243 = vmatprep.mubr.f32.mxu0 %v942_v0  ;;  %v768_v35 = vpack.c.bf16 %v376_v29, %v375_v27  ;;  %v345_v37 = vld [vmem:[#allocation8 + $0x50] sm:$0xff]  ;;  %v346_v38 = vld [vmem:[#allocation8 + $0x58] sm:$0xff]  ;;  %v770_v40 = vpack.c.bf16 %v394_v33, %v393_v32  ;;  %v363_v42 = vld [vmem:[#allocation8 + $0xe0] sm:$0xff] }
  0x81   :  { %320 = vmatprep.mubr.f32.mxu1 %v942_v0  ;;  %721 = vmatpush3.bf16.msra.mxu0 %v720_v49  ;;  %v728_v0 = vpack.c.bf16 %v340_v3, %v339_v2  ;;  %v377_v39 = vld [vmem:[#allocation8 + $0x150] sm:$0xff]  ;;  %v378_v41 = vld [vmem:[#allocation8 + $0x158] sm:$0xff]  ;;  %v364_v43 = vld [vmem:[#allocation8 + $0xe8] sm:$0xff]  ;;  %v740_v46 = vpack.c.bf16 %v346_v38, %v345_v37 }
  0x82   :  { %753 = vmatpush3.bf16.msra.mxu1 %v752_v50  ;;  %723 = vmatprep.subr.bf16.mxu0 %v722_v51  ;;  %v395_v44 = vld [vmem:[#allocation8 + $0x1e0] sm:$0xff]  ;;  %v396_v45 = vld [vmem:[#allocation8 + $0x1e8] sm:$0xff]  ;;  %v772_v47 = vpack.c.bf16 %v378_v41, %v377_v39  ;;  %v742_v48 = vpack.c.bf16 %v364_v43, %v363_v42  ;;  %v365_v56 = vld [vmem:[#allocation8 + $0xf0] sm:$0xff] }
  0x83   :  { %244 = vmatmul.mubr.f32.gmra.mrb[2].mxu0 %v86_v59  ;;  %755 = vmatprep.subr.bf16.mxu1 %v754_v55  ;;  %v774_v49 = vpack.c.bf16 %v396_v45, %v395_v44  ;;  %v347_v50 = vld [vmem:[#allocation8 + $0x60] sm:$0xff]  ;;  %v348_v51 = vld [vmem:[#allocation8 + $0x68] sm:$0xff]  ;;  %v366_v57 = vld [vmem:[#allocation8 + $0xf8] sm:$0xff] }
  0x84   :  { %321 = vmatmul.mubr.f32.gmra.mrb[2].mxu1 %v86_v59  ;;  %v379_v52 = vld [vmem:[#allocation8 + $0x160] sm:$0xff]  ;;  %v744_v53 = vpack.c.bf16 %v348_v51, %v347_v50  ;;  %v380_v54 = vld [vmem:[#allocation8 + $0x168] sm:$0xff]  ;;  %v397_v58 = vld [vmem:[#allocation8 + $0x1f0] sm:$0xff]  ;;  %v746_v59 = vpack.c.bf16 %v366_v57, %v365_v56 }
  0x85   :  { %725 = vmatpush3.bf16.msra.mxu0 %v724_v62  ;;  %v776_v55 = vpack.c.bf16 %v380_v54, %v379_v52  ;;  %v398_v60 = vld [vmem:[#allocation8 + $0x1f8] sm:$0xff]  ;;  %v349_v61 = vld [vmem:[#allocation8 + $0x70] sm:$0xff]  ;;  %v577_v41 = vld [vmem:[#allocation10] ss:$0 sm:$0xff] }
  0x86   :  { %757 = vmatpush3.bf16.msra.mxu1 %v756_v63  ;;  %727 = vmatprep.subr.bf16.mxu0 %v726_v1  ;;  %v350_v62 = vld [vmem:[#allocation8 + $0x78] sm:$0xff]  ;;  %v778_v63 = vpack.c.bf16 %v398_v60, %v397_v58  ;;  %v381_v2 = vld [vmem:[#allocation8 + $0x170] sm:$0xff] }
  0x87   :  { %759 = vmatprep.subr.bf16.mxu1 %v758_v5  ;;  %v748_v1 = vpack.c.bf16 %v350_v62, %v349_v61  ;;  %v382_v3 = vld [vmem:[#allocation8 + $0x178] sm:$0xff]  ;;  %v153_v5 = vlaneseq }
  0x88   :  { %v780_v4 = vpack.c.bf16 %v382_v3, %v381_v2  ;;  %v151_v8 = vld [vmem:[#allocation7] sm:$0xf] }
  0x89   :  { %729 = vmatpush3.bf16.msra.mxu0 %v728_v0  ;;  %v154_v6 = vshrl.u32 %v153_v5, 7 }
  0x8a   :  { %761 = vmatpush3.bf16.msra.mxu1 %v760_v11  ;;  %731 = vmatprep.subr.bf16.mxu0 %v730_v12 }
  0x8b   :  { %763 = vmatprep.subr.bf16.mxu1 %v762_v16  ;;  %v155_v7 = vsub.s32 0, %v154_v6  ;;  %v163_v9 = vsub.s32 2, %v154_v6  ;;  %v159_v10 = vsub.s32 1, %v154_v6  ;;  %v167_v0 = vsub.s32 3, %v154_v6 }
  0x8d   :  { %733 = vmatpush3.bf16.msra.mxu0 %v732_v22  ;;  %v156_v11 = vrot.slane %v151_v8, %v155_v7  ;;  %v164_v12 = vrot.slane %v151_v8, %v163_v9  ;;  %v160_v13 = vrot.slane %v151_v8, %v159_v10  ;;  %v168_v14 = vrot.slane %v151_v8, %v167_v0 }
  0x8e   :  { %765 = vmatpush3.bf16.msra.mxu1 %v764_v23  ;;  %735 = vmatprep.subr.bf16.mxu0 %v734_v24 }
  0x8f   :  { %767 = vmatprep.subr.bf16.mxu1 %v766_v28 }
  0x91   :  { %737 = vmatpush3.bf16.msra.mxu0 %v736_v34 }
  0x92   :  { %769 = vmatpush3.bf16.msra.mxu1 %v768_v35  ;;  %739 = vmatprep.subr.bf16.mxu0 %v738_v36 }
  0x93   :  { %771 = vmatprep.subr.bf16.mxu1 %v770_v40 }
  0x95   :  { %741 = vmatpush3.bf16.msra.mxu0 %v740_v46 }
  0x96   :  { %773 = vmatpush3.bf16.msra.mxu1 %v772_v47  ;;  %743 = vmatprep.subr.bf16.mxu0 %v742_v48 }
  0x97   :  { %775 = vmatprep.subr.bf16.mxu1 %v774_v49 }
  0x99   :  { %745 = vmatpush3.bf16.msra.mxu0 %v744_v53 }
  0x9a   :  { %777 = vmatpush3.bf16.msra.mxu1 %v776_v55  ;;  %747 = vmatprep.subr.bf16.mxu0 %v746_v59 }
  0x9b   :  { %779 = vmatprep.subr.bf16.mxu1 %v778_v63 }
  0x9d   :  { %749 = vmatpush3.bf16.msra.mxu0 %v748_v1 }
  0x9e   :  { %781 = vmatpush3.bf16.msra.mxu1 %v780_v4 }
 0x152   :  { %v239_v15 = vpop.f32.mrb[0].mxu0 }
 0x153   :  { %v240_v16 = vadd.f32 %v239_v15, %v156_v11  ;;  %v316_v17 = vpop.f32.mrb[0].mxu1  ;;  %v241_v18 = vpop.f32.mrb[1].mxu0 }
 0x154   :  { %v317_v19 = vadd.f32 %v316_v17, %v164_v12  ;;  %v242_v20 = vadd.f32 %v241_v18, %v160_v13  ;;  %v318_v21 = vpop.f32.mrb[1].mxu1 }
 0x155   :  { %v319_v22 = vadd.f32 %v318_v21, %v168_v14  ;;  %v327_v26 = vmax.f32 %v240_v16, 0.0 }
 0x156   :  { %v329_v23 = vmax.f32 %v317_v19, 0.0  ;;  %v328_v24 = vmax.f32 %v242_v20, 0.0  ;;  %v245_v25 = vpop.f32.mrb[2].mxu0 }
 0x157   :  { %v330_v27 = vmax.f32 %v319_v22, 0.0  ;;  %v246_v28 = vadd.f32 %v245_v25, %v156_v11  ;;  %v322_v29 = vpop.f32.mrb[2].mxu1  ;;  %v247_v30 = vpop.f32.mrb[3].mxu0 }
 0x158   :  { %v323_v31 = vadd.f32 %v322_v29, %v164_v12  ;;  %v248_v32 = vadd.f32 %v247_v30, %v160_v13  ;;  %v324_v33 = vpop.f32.mrb[3].mxu1  ;;  %470 = vmatprep.mubr.f32.mxu0 %v328_v24 }
 0x159   :  { %v325_v34 = vadd.f32 %v324_v33, %v168_v14  ;;  %545 = vmatprep.mubr.f32.mxu1 %v330_v27  ;;  %471 = vmatmul.mubr.f32.vlgmr.msra.gmra.mrb[4].mxu0 %v327_v26  ;;  %v331_v37 = vmax.f32 %v246_v28, 0.0 }
 0x15a   :  { %v333_v35 = vmax.f32 %v323_v31, 0.0  ;;  %v332_v36 = vmax.f32 %v248_v32, 0.0  ;;  %546 = vmatmul.mubr.f32.vlgmr.msra.gmra.mrb[4].mxu1 %v329_v23 }
 0x15b   :  { %v334_v38 = vmax.f32 %v325_v34, 0.0 }
 0x15c   :  { %475 = vmatprep.mubr.f32.mxu0 %v332_v36 }
 0x15d   :  { %550 = vmatprep.mubr.f32.mxu1 %v334_v38  ;;  %476 = vmatmul.mubr.f32.gmra.mrb[6].mxu0 %v331_v37 }
 0x15e   :  { %551 = vmatmul.mubr.f32.gmra.mrb[6].mxu1 %v333_v35 }
 0x22c   :  { %v610_v39 = vpop.f32.mrb[4].mxu0 }
 0x22d   :  { %v648_v40 = vpop.f32.mrb[4].mxu1  ;;  %v611_v42 = vpop.f32.mrb[5].mxu0 }
 0x22e   :  { %v612_v43 = vadd.f32 %v611_v42, %v610_v39  ;;  %v649_v44 = vpop.f32.mrb[5].mxu1 }
 0x22f   :  { %v650_v45 = vadd.f32 %v649_v44, %v648_v40 }
 0x230   :  { %v473_v46 = vadd.f32 %v612_v43, %v577_v41  ;;  %v613_v47 = vpop.f32.mrb[6].mxu0 }
 0x231   :  { %v651_v48 = vpop.f32.mrb[6].mxu1  ;;  %v614_v49 = vpop.f32.mrb[7].mxu0 }
 0x232   :  { %v548_v50 = vadd.f32 %v650_v45, %v473_v46  ;;  %v615_v51 = vadd.f32 %v614_v49, %v613_v47  ;;  %v652_v52 = vpop.f32.mrb[7].mxu1 }
 0x233   :  { %v653_v53 = vadd.f32 %v652_v52, %v651_v48 }
 0x234   :  { %556 = vst [vmem:[#allocation11] sm:$0xff] %v548_v50  ;;  %v478_v54 = vadd.f32 %v615_v51, %v577_v41 }
 0x236   :  { %v553_v55 = vadd.f32 %v653_v53, %v478_v54 }
 0x238   :  { %557 = vst [vmem:[#allocation11 + $0x8] sm:$0xff] %v553_v55 }
 0x239   :  { %914 = shalt.err (!%p911_p2)
}
 0x23a   :  { %s915_s8 = scalar_lea.hbm %s1064_s5, 256 }
 0x23b   :  { %p916_p3 = scmp.ne.s32.totalorder %s1064_s5, %s915_s8  ;;  %p919_p4 = scmp.lt.u32.totalorder %s915_s8, %s1064_s5 }
 0x23d   :  { %p921_p5 = pnand %p919_p4, %p916_p3 }
 0x23f   :  { %924 = shalt.err (!%p921_p5)
}
 0x240   :  { %569 = dma.vmem_to_hbm [thread:$0]  %s564_s3, 256, %s1064_s5, [#allocation4], %s938_s18, %s938_s18, %s939_s19  }
 0x241   :  { %931 = dma.done.wait [#allocation4], 256  }
 0x242   :  { %932 = vsyncadd [#allocation4], 4294967040 }
 0x243   :  { %573 = vsyncpa [#allocation3], 1 }
 0x244   :  { %574 = vsyncpa [#allocation6], 1 }
 0x245   :  { %575 = vsyncpa [#allocation9], 1 }
 0x246   :  { %576 = vsyncpa [#allocation4], 1 }

</bundles_post_ra>
